<compile_context>
chip_gen: v7x
topology: tpu7x:2x2x1
jax: 0.10.0
libtpu: 0.0.40
codegen_flags: <defaults>
</compile_context>

<pallas_src>
import functools

import jax
import jax.numpy as jnp
from jax.experimental import pallas as pl
from jax.experimental.pallas import tpu as pltpu

EPS = 1e-12          # torch.nn.functional.normalize default eps
NEG = -1.0e30        # finite "-inf" substitute (NaN-safe under arithmetic)
MiB = 1024 * 1024


def _round_up(x, m):
    return (x + m - 1) // m * m


def _cosface_kernel(featn_ref, wn_ref, labels_ref,        # inputs
                    lse_ref,                              # output
                    m_ref, l_ref,                         # scratch
                    *, margin_s, valid_c, mask_pad):
    c_idx = pl.program_id(1)
    nc = pl.num_programs(1)
    tb = featn_ref.shape[0]
    tc = wn_ref.shape[1]

    # ---- init running max / running sum(exp) on the first C-tile ----------
    @pl.when(c_idx == 0)
    def _init():
        m_ref[...] = jnp.full_like(m_ref, NEG)
        l_ref[...] = jnp.zeros_like(l_ref)

    # ---- scaled cosine for this C-tile (bf16 MXU operands, f32 accum) -----
    # feat was pre-normalized and pre-scaled by s; W was pre-normalized.
    cosine = jnp.dot(featn_ref[...], wn_ref[...],
                     preferred_element_type=jnp.float32)          # (tb, tc)

    # ---- CosFace margin on the label column (single where-select) ---------
    col = jax.lax.broadcasted_iota(jnp.int32, (tb, tc), 1) + c_idx * tc
    logits = jnp.where(col == labels_ref[...], cosine - margin_s, cosine)

    # ---- online logsumexp update -------------------------------------------
    def _update(lg):
        m_prev = m_ref[...]
        m_new = jnp.maximum(m_prev, jnp.max(lg, axis=1, keepdims=True))
        l_ref[...] = (l_ref[...] * jnp.exp(m_prev - m_new)
                      + jnp.sum(jnp.exp(lg - m_new), axis=1, keepdims=True))
        m_ref[...] = m_new

    if not mask_pad:
        _update(logits)                       # C % tc == 0: never any padding
    else:
        # Only the last C-tile can contain padded columns -> mask only there.
        @pl.when(c_idx != nc - 1)
        def _not_last():
            _update(logits)

        @pl.when(c_idx == nc - 1)
        def _last():
            _update(jnp.where(col < valid_c, logits, NEG))

    # ---- finalize: per-row logsumexp on the last C-tile ---------------------
    @pl.when(c_idx == nc - 1)
    def _finalize():
        lse_ref[...] = m_ref[...] + jnp.log(l_ref[...])


def cosface_loss_ml(feat, W, labels, *, s=1.0, margin=4.0, reduce=True,
                    block_b=256, block_c=2048, matmul_dtype=jnp.bfloat16):
    """JAX/Pallas equivalent of CosFaceLossML.forward.

    feat:   (B, feat_dim) float
    W:      (feat_dim, num_classes) float (the module parameter)
    labels: (B,) integer class ids
    Returns {'loss': scalar f32, 'n_terms': scalar} (same convention as the
    PyTorch module: n_terms = B when reduce=False, else 0.0).
    """
    B, D = feat.shape
    D2, C = W.shape
    assert D == D2
    labels = labels.astype(jnp.int32)
    s = float(s)
    margin = float(margin)

    # ---- per-generation budgets ---------------------------------------------
    try:
        vmem_cap = int(pltpu.get_tpu_info().vmem_capacity_bytes)
    except Exception:
        vmem_cap = 128 * MiB
    small_vmem = vmem_cap <= 64 * MiB            # v7x-class: 64 MiB VMEM, 2 TCs
    vmem_limit = 32 * MiB if small_vmem else 64 * MiB
    itemsize = jnp.dtype(matmul_dtype).itemsize

    # ---- tile sizes ----------------------------------------------------------
    Dp = _round_up(D, 128)
    tb = _round_up(min(int(block_b), _round_up(B, 8)), 8)
    if small_vmem and B >= 16 and _round_up(B, tb) // tb < 2:
        # 2-TC chip: make nb >= 2 so the "parallel" B axis shards across cores.
        tb = _round_up(-(-B // 2), 8)
    Bp = _round_up(B, tb)
    nb = Bp // tb

    tc = _round_up(min(int(block_c), _round_up(C, 128)), 128)
    budget = int(vmem_limit * 0.75)
    # double-buffered W tile + double-buffered feat tile must fit the budget
    while tc > 128 and 2 * (Dp * tc + tb * Dp) * itemsize > budget:
        tc = max(128, ((tc // 2) // 128) * 128)
    Cp = _round_up(C, tc)
    nc = Cp // tc

    # ---- wrapper-side prep (hoisted out of the kernel) -----------------------
    f32 = feat.astype(jnp.float32)
    inv_fn = jax.lax.rsqrt(
        jnp.maximum(jnp.sum(f32 * f32, axis=1, keepdims=True), EPS * EPS))
    feat_n = f32 * inv_fn                                        # (B, D) f32

    w32 = W.astype(jnp.float32)
    inv_wn = jax.lax.rsqrt(
        jnp.maximum(jnp.sum(w32 * w32, axis=0, keepdims=True), EPS * EPS))
    w_n = w32 * inv_wn                                           # (D, C) f32

    # target logit s*(cos_t - margin), tiny O(B*D) gather+reduce in XLA
    w_lab = jnp.take(w_n, labels, axis=1)                        # (D, B)
    cos_t = jnp.sum(feat_n * w_lab.T, axis=1)                    # (B,)
    tgt = s * (cos_t - margin)

    # pad + cast the MXU operands (scale folded into the features)
    featn_p = jnp.pad(feat_n * s, ((0, Bp - B), (0, Dp - D))).astype(matmul_dtype)
    wn_p = jnp.pad(w_n, ((0, Dp - D), (0, Cp - C))).astype(matmul_dtype)
    labels_p = jnp.pad(labels, (0, Bp - B)).reshape(Bp, 1)

    kernel = functools.partial(
        _cosface_kernel, margin_s=margin * s, valid_c=C, mask_pad=(Cp != C))

    lse_rows = pl.pallas_call(
        kernel,
        out_shape=jax.ShapeDtypeStruct((Bp, 1), jnp.float32),
        grid=(nb, nc),
        in_specs=[
            pl.BlockSpec((tb, Dp), lambda b, c: (b, 0)),   # normalized*s feat
            pl.BlockSpec((Dp, tc), lambda b, c: (0, c)),   # normalized W
            pl.BlockSpec((tb, 1),  lambda b, c: (b, 0)),   # labels
        ],
        out_specs=pl.BlockSpec((tb, 1), lambda b, c: (b, 0)),
        scratch_shapes=[
            pltpu.VMEM((tb, 1), jnp.float32),   # running max
            pltpu.VMEM((tb, 1), jnp.float32),   # running sum(exp)
        ],
        compiler_params=pltpu.CompilerParams(
            dimension_semantics=("parallel", "arbitrary"),
            vmem_limit_bytes=vmem_limit),
    )(featn_p, wn_p, labels_p)

    # per-row CE loss = logsumexp(logits) - logits[label]; padded rows dropped
    per_row = lse_rows[:B, 0] - tgt
    loss = jnp.sum(per_row) / B          # CrossEntropyLoss(reduction='mean')

    # Same (odd-looking) convention as the PyTorch module.
    if not reduce:
        n_terms = jnp.asarray(B, dtype=jnp.int32)
    else:
        n_terms = jnp.asarray(0.0, dtype=jnp.float32)
    return {"loss": loss, "n_terms": n_terms}


def _reference(feat, W, labels, s=1.0, margin=4.0):
    eps = 1e-12
    fn = feat / jnp.maximum(jnp.linalg.norm(feat, axis=1, keepdims=True), eps)
    wn = W / jnp.maximum(jnp.linalg.norm(W, axis=0, keepdims=True), eps)
    cosine = fn @ wn
    mask = jax.nn.one_hot(labels, W.shape[1], dtype=cosine.dtype)
    logits = (cosine - margin * mask) * s
    logp = jax.nn.log_softmax(logits, axis=-1)
    return -jnp.mean(jnp.sum(logp * mask, axis=-1))


if __name__ == "__main__":
    key = jax.random.PRNGKey(0)

    # Config 1: tiny shapes consistent with the module (single-tile path,
    # exercises D and C zero-padding to 128).
    B, D, C = 8, 32, 16
    k1, k2, k3, key = jax.random.split(key, 4)
    feat = jax.random.normal(k1, (B, D), dtype=jnp.float32)
    W = jax.random.normal(k2, (D, C), dtype=jnp.float32)
    labels = jax.random.randint(k3, (B,), 0, C, dtype=jnp.int32)

    out = cosface_loss_ml(feat, W, labels, s=1.0, margin=4.0, reduce=True)
    loss = jax.block_until_ready(out["loss"])
    ref = _reference(feat, W, labels, s=1.0, margin=4.0)
    assert jnp.allclose(loss, ref, atol=5e-2, rtol=1e-2), (loss, ref)

    # Config 2: exercises B padding, multiple B-tiles ("parallel" axis) and
    # the multi-C-tile online-logsumexp path incl. last-tile padded-class mask.
    B2, D2, C2 = 10, 40, 300
    k1, k2, k3, key = jax.random.split(key, 4)
    feat2 = jax.random.normal(k1, (B2, D2), dtype=jnp.float32)
    W2 = jax.random.normal(k2, (D2, C2), dtype=jnp.float32)
    labels2 = jax.random.randint(k3, (B2,), 0, C2, dtype=jnp.int32)

    out2 = cosface_loss_ml(feat2, W2, labels2, s=1.0, margin=4.0, reduce=True,
                           block_b=8, block_c=128)
    loss2 = jax.block_until_ready(out2["loss"])
    ref2 = _reference(feat2, W2, labels2, s=1.0, margin=4.0)
    assert jnp.allclose(loss2, ref2, atol=5e-2, rtol=1e-2), (loss2, ref2)

    print("KERNEL_OK")
</pallas_src>

<mosaic_0001>
module attributes {stable_mosaic.version = 11 : i64} {
  func.func @_cosface_kernel(%arg0: i32, %arg1: i32, %arg2: memref<8x128xbf16, #tpu.memory_space<vmem>>, %arg3: memref<128x128xbf16, #tpu.memory_space<vmem>>, %arg4: memref<8x1xi32, #tpu.memory_space<vmem>>, %arg5: memref<8x1xf32, #tpu.memory_space<vmem>>, %arg6: memref<8x1xf32, #tpu.memory_space<vmem>>, %arg7: memref<8x1xf32, #tpu.memory_space<vmem>>) attributes {dimension_semantics = [#tpu.dimension_semantics<parallel>, #tpu.dimension_semantics<arbitrary>], iteration_bounds = array<i64: 1, 1>, scalar_prefetch = 0 : i64, scratch_operands = 2 : i64, tpu.core_type = #tpu.core_type<tc>, window_params = [{transform_indices = @transform_0, window_bounds = array<i64: 8, 128>}, {transform_indices = @transform_1, window_bounds = array<i64: 128, 128>}, {transform_indices = @transform_2, window_bounds = array<i64: 8, 1>}, {transform_indices = @transform_3, window_bounds = array<i64: 8, 1>}]} {
    %c0_i32 = arith.constant 0 : i32
    %0 = arith.cmpi eq, %arg1, %c0_i32 : i32
    %1 = arith.extui %0 : i1 to i32
    %c0_i32_0 = arith.constant 0 : i32
    %2 = arith.cmpi ne, %1, %c0_i32_0 : i32
    scf.if %2 {
      %cst_13 = arith.constant -1.000000e+30 : f32
      %25 = vector.broadcast %cst_13 : f32 to vector<8x1xf32>
      %c0_14 = arith.constant 0 : index
      %c0_15 = arith.constant 0 : index
      %26 = vector.load %arg6[%c0_14, %c0_15] : memref<8x1xf32, #tpu.memory_space<vmem>>, vector<8x1xf32>
      tpu.vector_store %arg6[%c0_14, %c0_15], %25 {strides = array<i32>} : memref<8x1xf32, #tpu.memory_space<vmem>>, vector<8x1xf32>,
      %cst_16 = arith.constant 0.000000e+00 : f32
      %27 = vector.broadcast %cst_16 : f32 to vector<8x1xf32>
      %c0_17 = arith.constant 0 : index
      %c0_18 = arith.constant 0 : index
      %28 = vector.load %arg7[%c0_17, %c0_18] : memref<8x1xf32, #tpu.memory_space<vmem>>, vector<8x1xf32>
      tpu.vector_store %arg7[%c0_17, %c0_18], %27 {strides = array<i32>} : memref<8x1xf32, #tpu.memory_space<vmem>>, vector<8x1xf32>,
    } else {
    }
    %c0 = arith.constant 0 : index
    %c0_1 = arith.constant 0 : index
    %3 = vector.load %arg2[%c0, %c0_1] : memref<8x128xbf16, #tpu.memory_space<vmem>>, vector<8x128xbf16>
    %c0_2 = arith.constant 0 : index
    %c0_3 = arith.constant 0 : index
    %4 = vector.load %arg3[%c0_2, %c0_3] : memref<128x128xbf16, #tpu.memory_space<vmem>>, vector<128x128xbf16>
    %cst = arith.constant dense<0.000000e+00> : vector<8x128xf32>
    %5 = tpu.matmul %3, %4, %cst {dimension_numbers = #tpu.dot_dimension_numbers<[1], [0], [0], [1], [0, 0, 1, 1], [], []>} : vector<8x128xbf16>, vector<128x128xbf16>, vector<8x128xf32> -> vector<8x128xf32>
    %6 = tpu.iota {dimensions = array<i32: 1>} : vector<8x128xi32>
    %c128_i32 = arith.constant 128 : i32
    %7 = arith.muli %arg1, %c128_i32 : i32
    %8 = vector.broadcast %7 : i32 to vector<8x128xi32>
    %9 = arith.addi %6, %8 : vector<8x128xi32>
    %c0_4 = arith.constant 0 : index
    %c0_5 = arith.constant 0 : index
    %10 = vector.load %arg4[%c0_4, %c0_5] : memref<8x1xi32, #tpu.memory_space<vmem>>, vector<8x1xi32>
    %11 = vector.broadcast %10 : vector<8x1xi32> to vector<8x128xi32>
    %12 = arith.cmpi eq, %9, %11 : vector<8x128xi32>
    %cst_6 = arith.constant 4.000000e+00 : f32
    %13 = vector.broadcast %cst_6 : f32 to vector<8x128xf32>
    %14 = arith.subf %5, %13 : vector<8x128xf32>
    %15 = arith.select %12, %14, %5 : vector<8x128xi1>, vector<8x128xf32>
    %c0_i32_7 = arith.constant 0 : i32
    %16 = arith.cmpi ne, %arg1, %c0_i32_7 : i32
    %17 = arith.extui %16 : i1 to i32
    %c0_i32_8 = arith.constant 0 : i32
    %18 = arith.cmpi ne, %17, %c0_i32_8 : i32
    scf.if %18 {
      %c0_13 = arith.constant 0 : index
      %c0_14 = arith.constant 0 : index
      %25 = vector.load %arg6[%c0_13, %c0_14] : memref<8x1xf32, #tpu.memory_space<vmem>>, vector<8x1xf32>
      %cst_15 = arith.constant dense<0xFF800000> : vector<8xf32>
      %26 = vector.multi_reduction <maximumf>, %15, %cst_15 [1] : vector<8x128xf32> to vector<8xf32>
      %27 = vector.shape_cast %26 : vector<8xf32> to vector<8x1xf32>
      %28 = arith.maximumf %25, %27 : vector<8x1xf32>
      %c0_16 = arith.constant 0 : index
      %c0_17 = arith.constant 0 : index
      %29 = vector.load %arg7[%c0_16, %c0_17] : memref<8x1xf32, #tpu.memory_space<vmem>>, vector<8x1xf32>
      %30 = arith.subf %25, %28 : vector<8x1xf32>
      %31 = math.exp %30 : vector<8x1xf32>
      %32 = arith.mulf %29, %31 : vector<8x1xf32>
      %33 = vector.broadcast %28 : vector<8x1xf32> to vector<8x128xf32>
      %34 = arith.subf %15, %33 : vector<8x128xf32>
      %35 = math.exp %34 : vector<8x128xf32>
      %cst_18 = arith.constant dense<0.000000e+00> : vector<8xf32>
      %36 = vector.multi_reduction <add>, %35, %cst_18 [1] : vector<8x128xf32> to vector<8xf32>
      %37 = vector.shape_cast %36 : vector<8xf32> to vector<8x1xf32>
      %38 = arith.addf %32, %37 : vector<8x1xf32>
      %c0_19 = arith.constant 0 : index
      %c0_20 = arith.constant 0 : index
      %39 = vector.load %arg7[%c0_19, %c0_20] : memref<8x1xf32, #tpu.memory_space<vmem>>, vector<8x1xf32>
      tpu.vector_store %arg7[%c0_19, %c0_20], %38 {strides = array<i32>} : memref<8x1xf32, #tpu.memory_space<vmem>>, vector<8x1xf32>,
      %c0_21 = arith.constant 0 : index
      %c0_22 = arith.constant 0 : index
      %40 = vector.load %arg6[%c0_21, %c0_22] : memref<8x1xf32, #tpu.memory_space<vmem>>, vector<8x1xf32>
      tpu.vector_store %arg6[%c0_21, %c0_22], %28 {strides = array<i32>} : memref<8x1xf32, #tpu.memory_space<vmem>>, vector<8x1xf32>,
    } else {
    }
    %c0_i32_9 = arith.constant 0 : i32
    %19 = arith.cmpi eq, %arg1, %c0_i32_9 : i32
    %20 = arith.extui %19 : i1 to i32
    %c0_i32_10 = arith.constant 0 : i32
    %21 = arith.cmpi ne, %20, %c0_i32_10 : i32
    scf.if %21 {
      %c16_i32 = arith.constant 16 : i32
      %25 = vector.broadcast %c16_i32 : i32 to vector<8x128xi32>
      %26 = arith.cmpi slt, %9, %25 : vector<8x128xi32>
      %cst_13 = arith.constant -1.000000e+30 : f32
      %27 = vector.broadcast %cst_13 : f32 to vector<8x128xf32>
      %28 = arith.select %26, %15, %27 : vector<8x128xi1>, vector<8x128xf32>
      %c0_14 = arith.constant 0 : index
      %c0_15 = arith.constant 0 : index
      %29 = vector.load %arg6[%c0_14, %c0_15] : memref<8x1xf32, #tpu.memory_space<vmem>>, vector<8x1xf32>
      %cst_16 = arith.constant dense<0xFF800000> : vector<8xf32>
      %30 = vector.multi_reduction <maximumf>, %28, %cst_16 [1] : vector<8x128xf32> to vector<8xf32>
      %31 = vector.shape_cast %30 : vector<8xf32> to vector<8x1xf32>
      %32 = arith.maximumf %29, %31 : vector<8x1xf32>
      %c0_17 = arith.constant 0 : index
      %c0_18 = arith.constant 0 : index
      %33 = vector.load %arg7[%c0_17, %c0_18] : memref<8x1xf32, #tpu.memory_space<vmem>>, vector<8x1xf32>
      %34 = arith.subf %29, %32 : vector<8x1xf32>
      %35 = math.exp %34 : vector<8x1xf32>
      %36 = arith.mulf %33, %35 : vector<8x1xf32>
      %37 = vector.broadcast %32 : vector<8x1xf32> to vector<8x128xf32>
      %38 = arith.subf %28, %37 : vector<8x128xf32>
      %39 = math.exp %38 : vector<8x128xf32>
      %cst_19 = arith.constant dense<0.000000e+00> : vector<8xf32>
      %40 = vector.multi_reduction <add>, %39, %cst_19 [1] : vector<8x128xf32> to vector<8xf32>
      %41 = vector.shape_cast %40 : vector<8xf32> to vector<8x1xf32>
      %42 = arith.addf %36, %41 : vector<8x1xf32>
      %c0_20 = arith.constant 0 : index
      %c0_21 = arith.constant 0 : index
      %43 = vector.load %arg7[%c0_20, %c0_21] : memref<8x1xf32, #tpu.memory_space<vmem>>, vector<8x1xf32>
      tpu.vector_store %arg7[%c0_20, %c0_21], %42 {strides = array<i32>} : memref<8x1xf32, #tpu.memory_space<vmem>>, vector<8x1xf32>,
      %c0_22 = arith.constant 0 : index
      %c0_23 = arith.constant 0 : index
      %44 = vector.load %arg6[%c0_22, %c0_23] : memref<8x1xf32, #tpu.memory_space<vmem>>, vector<8x1xf32>
      tpu.vector_store %arg6[%c0_22, %c0_23], %32 {strides = array<i32>} : memref<8x1xf32, #tpu.memory_space<vmem>>, vector<8x1xf32>,
    } else {
    }
    %c0_i32_11 = arith.constant 0 : i32
    %22 = arith.cmpi eq, %arg1, %c0_i32_11 : i32
    %23 = arith.extui %22 : i1 to i32
    %c0_i32_12 = arith.constant 0 : i32
    %24 = arith.cmpi ne, %23, %c0_i32_12 : i32
    scf.if %24 {
      %c0_13 = arith.constant 0 : index
      %c0_14 = arith.constant 0 : index
      %25 = vector.load %arg6[%c0_13, %c0_14] : memref<8x1xf32, #tpu.memory_space<vmem>>, vector<8x1xf32>
      %c0_15 = arith.constant 0 : index
      %c0_16 = arith.constant 0 : index
      %26 = vector.load %arg7[%c0_15, %c0_16] : memref<8x1xf32, #tpu.memory_space<vmem>>, vector<8x1xf32>
      %27 = math.log %26 : vector<8x1xf32>
      %28 = arith.addf %25, %27 : vector<8x1xf32>
      %c0_17 = arith.constant 0 : index
      %c0_18 = arith.constant 0 : index
      %29 = vector.load %arg5[%c0_17, %c0_18] : memref<8x1xf32, #tpu.memory_space<vmem>>, vector<8x1xf32>
      tpu.vector_store %arg5[%c0_17, %c0_18], %28 {strides = array<i32>} : memref<8x1xf32, #tpu.memory_space<vmem>>, vector<8x1xf32>,
    } else {
    }
    return
  }
  func.func @transform_0(%arg0: i32, %arg1: i32) -> (i32, i32) {
    %c0_i32 = arith.constant 0 : i32
    %c0_i32_0 = arith.constant 0 : i32
    return %arg0, %c0_i32 : i32, i32
  }
  func.func @transform_1(%arg0: i32, %arg1: i32) -> (i32, i32) {
    %c0_i32 = arith.constant 0 : i32
    %c0_i32_0 = arith.constant 0 : i32
    return %c0_i32, %arg1 : i32, i32
  }
  func.func @transform_2(%arg0: i32, %arg1: i32) -> (i32, i32) {
    %c0_i32 = arith.constant 0 : i32
    %c0_i32_0 = arith.constant 0 : i32
    return %arg0, %c0_i32 : i32, i32
  }
  func.func @transform_3(%arg0: i32, %arg1: i32) -> (i32, i32) {
    %c0_i32 = arith.constant 0 : i32
    %c0_i32_0 = arith.constant 0 : i32
    return %arg0, %c0_i32 : i32, i32
  }
}

</mosaic_0001>

<bundles_post_ra>
// kernel: tpu_custom_call.1
= control target key start
LH: loop header
LB: loop body
LE: loop exit
PB: predicated region body
PF: predicated region fallthrough
CT: control target
= control target key end

     0   :  { %8 = vsyncpa [#allocation5], 0  ;;  %s495_s0 = inlined_call_operand.hbm [shape: bf16[8,128], index: 0, kind: input, shape index: {}]   ;;  %s496_s1 = inlined_call_operand.hbm [shape: bf16[128,128], index: 1, kind: input, shape index: {}]   ;;  %s497_s2 = inlined_call_operand.hbm [shape: s32[8,1], index: 2, kind: input, shape index: {}]   ;;  %s498_s3 = inlined_call_operand.hbm [shape: f32[8,1], index: 3, kind: output, shape index: {}]  }
   0x1   :  { %9 = vsyncpa [#allocation8], 0 }
   0x2   :  { %10 = vsyncpa [#allocation6], 0  ;;  %s412_s12 = smov [#allocation7]   ;;  %s318_s16 = scalar_lea.hbm %s496_s1, 1024 }
   0x3   :  { %s26_s13 = sshll.u32 %s412_s12, 4  ;;  %p319_p0 = scmp.ne.s32.totalorder %s496_s1, %s318_s16  ;;  %s27_s13 = int_to_ptr.vmem [resolvable:$true] %s26_s13 }
   0x4   :  { %p322_p1 = scmp.lt.u32.totalorder %s318_s16, %s496_s1 }
   0x6   :  { %p324_p2 = pnand %p322_p1, %p319_p0 }
   0x8   :  { %327 = shalt.err (!%p324_p2)
}
   0x9   :  { %s328_s21 = scalar_lea.vmem %s27_s13, 1024  ;;  %p333_p4 = scmp.lt.s32.totalorder %s27_s13, %s27_s13 }
   0xa   :  { %p329_p3 = scmp.ne.s32.totalorder %s27_s13, %s328_s21  ;;  %p334_p5 = scmp.lt.s32.totalorder %s328_s21, %s328_s21 }
   0xc   :  { %p335_p6 = por %p334_p5, %p333_p4 }
   0xe   :  { %p336_p7 = pnand %p335_p6, %p329_p3 }
  0x10   :  { %339 = shalt.err (!%p336_p7)
}
  0x11   :  { %s413_s22 = smov 64   ;;  %s414_s23 = smov 4  }
  0x12   :  { %32 = dma.hbm_to_vmem [thread:$0]  %s496_s1, 1024, %s27_s13, [#allocation8], %s413_s22, %s413_s22, %s414_s23  }
  0x13   :  { %s415_s26 = smov [#allocation4]   ;;  %s416_s28 = smov [#allocation9]  }
  0x14   :  { %s17_s27 = sshll.u32 %s415_s26, 4  ;;  %s39_s29 = sshll.u32 %s416_s28, 4  ;;  %s18_s27 = int_to_ptr.vmem [resolvable:$true] %s17_s27  ;;  %s40_s29 = int_to_ptr.vmem [resolvable:$true] %s39_s29 }
  0x15   :  { %s340_s5 = scalar_lea.hbm %s495_s0, 64 }
  0x16   :  { %p341_p8 = scmp.ne.s32.totalorder %s495_s0, %s340_s5  ;;  %p344_p9 = scmp.lt.u32.totalorder %s340_s5, %s495_s0 }
  0x18   :  { %p346_p10 = pnand %p344_p9, %p341_p8 }
  0x1a   :  { %349 = shalt.err (!%p346_p10)
}
  0x1b   :  { %s350_s1 = scalar_lea.vmem %s18_s27, 64  ;;  %p355_p12 = scmp.lt.s32.totalorder %s18_s27, %s18_s27 }
  0x1c   :  { %p351_p11 = scmp.ne.s32.totalorder %s18_s27, %s350_s1  ;;  %p356_p13 = scmp.lt.s32.totalorder %s350_s1, %s350_s1 }
  0x1e   :  { %p357_p0 = por %p356_p13, %p355_p12 }
  0x20   :  { %p358_p1 = pnand %p357_p0, %p351_p11 }
  0x22   :  { %361 = shalt.err (!%p358_p1)
}
  0x23   :  { %20 = dma.hbm_to_vmem [thread:$0]  %s495_s0, 64, %s18_s27, [#allocation5]  }
  0x24   :  { %s362_s14 = scalar_lea.hbm %s497_s2, 128 }
  0x25   :  { %p363_p2 = scmp.ne.s32.totalorder %s497_s2, %s362_s14  ;;  %p366_p3 = scmp.lt.u32.totalorder %s362_s14, %s497_s2 }
  0x27   :  { %p368_p4 = pnand %p366_p3, %p363_p2 }
  0x29   :  { %371 = shalt.err (!%p368_p4)
}
  0x2a   :  { %s372_s19 = scalar_lea.vmem %s40_s29, 128  ;;  %p377_p6 = scmp.lt.s32.totalorder %s40_s29, %s40_s29 }
  0x2b   :  { %p373_p5 = scmp.ne.s32.totalorder %s40_s29, %s372_s19  ;;  %p378_p7 = scmp.lt.s32.totalorder %s372_s19, %s372_s19 }
  0x2d   :  { %p379_p8 = por %p378_p7, %p377_p6 }
  0x2f   :  { %p380_p9 = pnand %p379_p8, %p373_p5 }
  0x31   :  { %383 = shalt.err (!%p380_p9)
}
  0x32   :  { %42 = dma.hbm_to_vmem [thread:$0]  %s497_s2, 128, %s40_s29, [#allocation8]  }
  0x33   :  { %406 = dma.done.wait [#allocation5], 64  }
  0x34   :  { %407 = vsyncadd [#allocation5], 4294967232 }
  0x35   :  { %408 = dma.done.wait [#allocation8], 1152  }
  0x36   :  { %409 = vsyncadd [#allocation8], 4294966144  ;;  %v417_v0 = vmov 0.0   ;;  %vm418_vm0 = vmmov 0   ;;  %v419_v1 = vmov 0   ;;  %v304_v2 = vld [vmem:[#allocation7] sm:$0xff]   ;;  %v165_v13 = vlaneseq }
  0x37   :  { %272 = vmatprep.subr.bf16.mxu0 %v417_v0  ;;  %288 = vmatprep.mubr.msk.bf16.mxu0 %vm418_vm0, %v417_v0  ;;  %v305_v3 = vld [vmem:[#allocation7 + $0x8] sm:$0xff]   ;;  %v306_v4 = vld [vmem:[#allocation7 + $0x10] sm:$0xff]   ;;  %v170_v5 = vld [vmem:[#allocation9] sm:$0xff]  ;;  %vm57_vm1 = vcmask 7168   ;;  %v420_v12 = vmov -1e+30  }
  0x38   :  { %302 = vset.pattern.permute.xlu0 %v419_v1  ;;  %303 = vset.pattern.permute.xlu1 %v419_v1  ;;  %v307_v6 = vld [vmem:[#allocation7 + $0x18] sm:$0xff]   ;;  %v308_v7 = vld [vmem:[#allocation7 + $0x20] sm:$0xff]   ;;  %v309_v8 = vld [vmem:[#allocation7 + $0x28] sm:$0xff]   ;;  %58 = vst.msk [vmem:[#allocation2] sm:$0xff] %vm57_vm1, %v420_v12  ;;  %v166_v14 = vand.u32 127, %v165_v13  ;;  %s421_s2 = smov [#allocation10]  }
  0x39   :  { %273 = vmatpush3.bf16.msra.mxu0 %v304_v2  ;;  %172 = vperm.xlu0 %302, %v170_v5   ;;  %v310_v9 = vld [vmem:[#allocation7 + $0x30] sm:$0xff]   ;;  %v311_v10 = vld [vmem:[#allocation7 + $0x38] sm:$0xff]   ;;  %59 = vst.msk [vmem:[#allocation3] sm:$0xff] %vm57_vm1, %v417_v0  ;;  %s244_s21 = sshll.u32 %s421_s2, 4  ;;  %s245_s21 = int_to_ptr.vmem [resolvable:$true] %s244_s21 }
  0x3a   :  { %274 = vmatprep.subr.bf16.mxu0 %v417_v0  ;;  %v60_v11 = vld [vmem:[#allocation4] sm:$0xf]  ;;  %vm207_vm3 = vcmp.lt.s32.totalorder %v166_v14, 16  ;;  %s384_s22 = scalar_lea.vmem %s245_s21, 128  ;;  %p389_p11 = scmp.lt.s32.totalorder %s245_s21, %s245_s21 }
  0x3b   :  { %p385_p10 = scmp.ne.s32.totalorder %s245_s21, %s384_s22  ;;  %p390_p12 = scmp.lt.s32.totalorder %s384_s22, %s384_s22 }
  0x3d   :  { %275 = vmatpush3.bf16.msra.mxu0 %v305_v3  ;;  %p391_p13 = por %p390_p12, %p389_p11 }
  0x3e   :  { %276 = vmatprep.subr.bf16.mxu0 %v417_v0 }
  0x3f   :  { %v209_v23 = vld [vmem:[#allocation2] sm:$0xff]  ;;  %p392_p0 = pnand %p391_p13, %p385_p10 }
  0x40   :  { %v213_v33 = vld [vmem:[#allocation3] sm:$0xff] }
  0x41   :  { %277 = vmatpush3.bf16.msra.mxu0 %v306_v4 }
  0x42   :  { %278 = vmatprep.subr.bf16.mxu0 %v417_v0 }
  0x45   :  { %279 = vmatpush3.bf16.msra.mxu0 %v307_v6 }
  0x46   :  { %280 = vmatprep.subr.bf16.mxu0 %v417_v0 }
  0x49   :  { %281 = vmatpush3.bf16.msra.mxu0 %v308_v7 }
  0x4a   :  { %282 = vmatprep.subr.bf16.mxu0 %v417_v0 }
  0x4d   :  { %283 = vmatpush3.bf16.msra.mxu0 %v309_v8 }
  0x4e   :  { %284 = vmatprep.subr.bf16.mxu0 %v417_v0 }
  0x51   :  { %285 = vmatpush3.bf16.msra.mxu0 %v310_v9 }
  0x52   :  { %286 = vmatprep.subr.bf16.mxu0 %v417_v0 }
  0x55   :  { %287 = vmatpush3.bf16.msra.mxu0 %v311_v10 }
  0x58   :  { %289 = vmatmul.mubr.bf16.vlgmr.msra.gmra.mrb[0].mxu0 %v60_v11 }
  0xb8   :  { %v173_v15 = vpop.permute.xlu0 %172 }
  0xb9   :  { %vm174_vm2 = vcmp.eq.s32.totalorder %v166_v14, %v173_v15 }
 0x12b   :  { %v159_v16 = vpop.f32.mrb[0].mxu0 }
 0x12c   :  { %v262_v17 = vadd.f32 -4.0, %v159_v16  ;;  %v290_v18 = vpop.f32.mrb[1].mxu0 }
 0x12d   :  { %v162_v19 = vpop.f32.mrb[2].mxu0 }
 0x12e   :  { %v291_v20 = vpop.f32.mrb[3].mxu0  ;;  %v176_v21 = vsel %vm174_vm2, %v262_v17, %v159_v16 }
 0x12f   :  { %v208_v22 = vsel %vm207_vm3, %v176_v21, -1e+30 }
 0x130   :  { %210 = vmax.xlane.f32.xlu0 %v208_v22 }
 0x1bd   :  { %v211_v24 = vpop.xlane.xlu0 %210 }
 0x1be   :  { %v212_v25 = vmax.f32 %v209_v23, %v211_v24 }
 0x1c0   :  { %v214_v26 = vsub.f32 %v209_v23, %v212_v25  ;;  %231 = vst.msk [vmem:[#allocation2] sm:$0xff] %vm57_vm1, %v212_v25  ;;  %220 = vperm.xlu1 %303, %v212_v25  }
 0x1c2   :  { %v215_v31 = vmul.f32 1.442695, %v214_v26 }
 0x1c7   :  { %v232_v40 = vld [vmem:[#allocation2] sm:$0xff] }
 0x23f   :  { %v221_v27 = vpop.permute.xlu1 %220 }
 0x240   :  { %v223_v28 = vsub.f32 %v208_v22, %v221_v27 }
 0x242   :  { %v224_v29 = vmul.f32 1.442695, %v223_v28 }
 0x244   :  { %312 = vpow2.f32 %v224_v29 }
 0x245   :  { %314 = vpow2.f32 %v215_v31 }
 0x24e   :  { %v313_v30 = vpop.eup %312 }
 0x24f   :  { %226 = vadd.xlane.f32.xlu1 %v313_v30  ;;  %v315_v32 = vpop.eup %314 }
 0x250   :  { %v217_v34 = vmul.f32 %v315_v32, %v213_v33 }
 0x2dc   :  { %v227_v35 = vpop.xlane.xlu1 %226 }
 0x2dd   :  { %v228_v36 = vadd.f32 %v227_v35, %v217_v34 }
 0x2df   :  { %230 = vst.msk [vmem:[#allocation3] sm:$0xff] %vm57_vm1, %v228_v36 }
 0x2e6   :  { %v233_v37 = vld [vmem:[#allocation3] sm:$0xff] }
 0x2e7   :  { %316 = vlog2.f32 %v233_v37 }
 0x2f1   :  { %v317_v38 = vpop.eup %316 }
 0x2f2   :  { %v235_v39 = vmul.f32 0.6931472, %v317_v38 }
 0x2f4   :  { %v236_v41 = vadd.f32 %v235_v39, %v232_v40 }
 0x2f6   :  { %237 = vst.msk [vmem:[#allocation10] sm:$0xff] %vm57_vm1, %v236_v41 }
 0x2f7   :  { %395 = shalt.err (!%p392_p0)
}
 0x2f8   :  { %s396_s25 = scalar_lea.hbm %s498_s3, 128 }
 0x2f9   :  { %p397_p1 = scmp.ne.s32.totalorder %s498_s3, %s396_s25  ;;  %p400_p2 = scmp.lt.u32.totalorder %s396_s25, %s498_s3 }
 0x2fb   :  { %p402_p3 = pnand %p400_p2, %p397_p1 }
 0x2fd   :  { %405 = shalt.err (!%p402_p3)
}
 0x2fe   :  { %247 = dma.vmem_to_hbm [thread:$0]  %s245_s21, 128, %s498_s3, [#allocation6]  }
 0x2ff   :  { %410 = dma.done.wait [#allocation6], 128  }
 0x300   :  { %411 = vsyncadd [#allocation6], 4294967168 }
 0x301   :  { %251 = vsyncpa [#allocation5], 1 }
 0x302   :  { %252 = vsyncpa [#allocation8], 1 }
 0x303   :  { %253 = vsyncpa [#allocation6], 1 }

</bundles_post_ra>
